<compile_context>
chip_gen: v5e
topology: v5e:2x2
jax: 0.10.0
libtpu: 0.0.40
codegen_flags: <defaults>
</compile_context>

<pallas_src>
import jax
import jax.numpy as jnp
from jax.experimental import pallas as pl
from jax.experimental.pallas import tpu as pltpu

HIDDEN = 32
MAX_TB = 2048        # max batch-tile rows (multiple of 8 sublanes)


def _round_up(x, m):
    return (x + m - 1) // m * m


def _mlp_kernel(x_ref, w1_ref, b1_ref, w2_ref, b2_ref, w3_ref, b3_ref, o_ref):
    # Layer 1: (TB, IN) @ (IN, 32) + (1, 32) -> ReLU
    h1 = jnp.dot(x_ref[...], w1_ref[...], preferred_element_type=jnp.float32)
    h1 = jnp.maximum(h1 + b1_ref[...], 0.0)
    # Layer 2: (TB, 32) @ (32, 32) + (1, 32) -> ReLU
    h2 = jnp.dot(h1, w2_ref[...], preferred_element_type=jnp.float32)
    h2 = jnp.maximum(h2 + b2_ref[...], 0.0)
    # Layer 3: (TB, 32) @ (32, OUT) + (1, OUT)  (no activation)
    out = jnp.dot(h2, w3_ref[...], preferred_element_type=jnp.float32)
    o_ref[...] = (out + b3_ref[...]).astype(o_ref.dtype)


def regressor_forward(x, params):
    """x: [B, input_dim] float32; params: dict of logical-shape weights/biases."""
    B, input_dim = x.shape
    out_dim = params["w3"].shape[1]

    # Batch tile: multiple of 8 sublanes, capped at MAX_TB.  Prefer an even
    # number of grid steps (when there is enough work) so the two v7x
    # TensorCores get balanced tiles under dimension_semantics=("parallel",).
    n_tiles = pl.cdiv(B, MAX_TB)
    if B >= 16 and n_tiles % 2 == 1:
        n_tiles += 1
    tb = _round_up(pl.cdiv(B, n_tiles), 8)
    grid = (pl.cdiv(B, tb),)

    resident = lambda shape: pl.BlockSpec(shape, lambda i: (0, 0))

    flops = 2 * B * (input_dim * HIDDEN + HIDDEN * HIDDEN + HIDDEN * out_dim)
    bytes_accessed = 4 * (
        B * (input_dim + out_dim)
        + input_dim * HIDDEN + HIDDEN * HIDDEN + HIDDEN * out_dim
        + 2 * HIDDEN + out_dim
    )

    return pl.pallas_call(
        _mlp_kernel,
        out_shape=jax.ShapeDtypeStruct((B, out_dim), jnp.float32),
        grid_spec=pltpu.PrefetchScalarGridSpec(
            num_scalar_prefetch=0,
            grid=grid,
            in_specs=[
                pl.BlockSpec((tb, input_dim), lambda i: (i, 0)),  # x tile (pipelined)
                resident((input_dim, HIDDEN)),                    # w1
                resident((1, HIDDEN)),                            # b1
                resident((HIDDEN, HIDDEN)),                       # w2
                resident((1, HIDDEN)),                            # b2
                resident((HIDDEN, out_dim)),                      # w3
                resident((1, out_dim)),                           # b3
            ],
            out_specs=pl.BlockSpec((tb, out_dim), lambda i: (i, 0)),
        ),
        compiler_params=pltpu.CompilerParams(
            dimension_semantics=("parallel",),
            vmem_limit_bytes=64 * 1024 * 1024,
        ),
        cost_estimate=pl.CostEstimate(
            flops=flops, transcendentals=0, bytes_accessed=bytes_accessed
        ),
    )(x, params["w1"], params["b1"], params["w2"], params["b2"],
      params["w3"], params["b3"])


def init_params(key, input_dim, output_dim):
    """Deterministic init mimicking nn.Linear's uniform(-1/sqrt(fan_in), 1/sqrt(fan_in))."""
    ks = jax.random.split(key, 6)

    def linear(kw, kb, fan_in, fan_out):
        bound = 1.0 / jnp.sqrt(fan_in)
        # stored as [in, out] so the kernel does x @ W
        w = jax.random.uniform(kw, (fan_in, fan_out), jnp.float32, -bound, bound)
        b = jax.random.uniform(kb, (1, fan_out), jnp.float32, -bound, bound)
        return w, b

    w1, b1 = linear(ks[0], ks[1], input_dim, HIDDEN)
    w2, b2 = linear(ks[2], ks[3], HIDDEN, HIDDEN)
    w3, b3 = linear(ks[4], ks[5], HIDDEN, output_dim)
    return {"w1": w1, "b1": b1, "w2": w2, "b2": b2, "w3": w3, "b3": b3}


def _reference(x, p):
    h1 = jnp.maximum(x @ p["w1"] + p["b1"], 0.0)
    h2 = jnp.maximum(h1 @ p["w2"] + p["b2"], 0.0)
    return h2 @ p["w3"] + p["b3"]


if __name__ == "__main__":
    key = jax.random.PRNGKey(0)
    k_x, k_p = jax.random.split(key)

    batch, input_dim, output_dim = 8, 16, 4
    x = jax.random.normal(k_x, (batch, input_dim), jnp.float32)
    params = init_params(k_p, input_dim, output_dim)

    out = jax.block_until_ready(regressor_forward(x, params))
    ref = _reference(x, params)
    assert out.shape == (batch, output_dim)
    assert jnp.allclose(out, ref, atol=1e-5, rtol=1e-5)

    # Multi-tile and ragged batch sizes to exercise the grid / boundary path.
    for big_b in (1200, 1234):
        xb = jax.random.normal(k_x, (big_b, input_dim), jnp.float32)
        outb = jax.block_until_ready(regressor_forward(xb, params))
        assert outb.shape == (big_b, output_dim)
        assert jnp.allclose(outb, _reference(xb, params), atol=1e-5, rtol=1e-5)

    print("KERNEL_OK")
</pallas_src>

<mosaic_0001>
module attributes {stable_mosaic.version = 11 : i64} {
  func.func @_mlp_kernel(%arg0: i32, %arg1: memref<8x16xf32, #tpu.memory_space<vmem>>, %arg2: memref<16x32xf32, #tpu.memory_space<vmem>>, %arg3: memref<1x32xf32, #tpu.memory_space<vmem>>, %arg4: memref<32x32xf32, #tpu.memory_space<vmem>>, %arg5: memref<1x32xf32, #tpu.memory_space<vmem>>, %arg6: memref<32x4xf32, #tpu.memory_space<vmem>>, %arg7: memref<1x4xf32, #tpu.memory_space<vmem>>, %arg8: memref<8x4xf32, #tpu.memory_space<vmem>>) attributes {dimension_semantics = [#tpu.dimension_semantics<parallel>], iteration_bounds = array<i64: 1>, scalar_prefetch = 0 : i64, scratch_operands = 0 : i64, tpu.core_type = #tpu.core_type<tc>, window_params = [{transform_indices = @transform_0, window_bounds = array<i64: 8, 16>}, {pipeline_mode = #tpu.pipeline_mode<synchronous>, transform_indices = @transform_1, window_bounds = array<i64: 16, 32>}, {pipeline_mode = #tpu.pipeline_mode<synchronous>, transform_indices = @transform_2, window_bounds = array<i64: 1, 32>}, {pipeline_mode = #tpu.pipeline_mode<synchronous>, transform_indices = @transform_3, window_bounds = array<i64: 32, 32>}, {pipeline_mode = #tpu.pipeline_mode<synchronous>, transform_indices = @transform_4, window_bounds = array<i64: 1, 32>}, {pipeline_mode = #tpu.pipeline_mode<synchronous>, transform_indices = @transform_5, window_bounds = array<i64: 32, 4>}, {pipeline_mode = #tpu.pipeline_mode<synchronous>, transform_indices = @transform_6, window_bounds = array<i64: 1, 4>}, {transform_indices = @transform_7, window_bounds = array<i64: 8, 4>}]} {
    %c0 = arith.constant 0 : index
    %c0_0 = arith.constant 0 : index
    %0 = vector.load %arg1[%c0, %c0_0] : memref<8x16xf32, #tpu.memory_space<vmem>>, vector<8x16xf32>
    %c0_1 = arith.constant 0 : index
    %c0_2 = arith.constant 0 : index
    %1 = vector.load %arg2[%c0_1, %c0_2] : memref<16x32xf32, #tpu.memory_space<vmem>>, vector<16x32xf32>
    %cst = arith.constant dense<0.000000e+00> : vector<8x32xf32>
    %2 = tpu.matmul %0, %1, %cst {dimension_numbers = #tpu.dot_dimension_numbers<[1], [0], [0], [1], [0, 0, 1, 1], [], []>} : vector<8x16xf32>, vector<16x32xf32>, vector<8x32xf32> -> vector<8x32xf32>
    %c0_3 = arith.constant 0 : index
    %c0_4 = arith.constant 0 : index
    %3 = vector.load %arg3[%c0_3, %c0_4] : memref<1x32xf32, #tpu.memory_space<vmem>>, vector<1x32xf32>
    %4 = vector.broadcast %3 : vector<1x32xf32> to vector<8x32xf32>
    %5 = arith.addf %2, %4 : vector<8x32xf32>
    %cst_5 = arith.constant 0.000000e+00 : f32
    %6 = vector.broadcast %cst_5 : f32 to vector<8x32xf32>
    %7 = arith.maximumf %5, %6 : vector<8x32xf32>
    %c0_6 = arith.constant 0 : index
    %c0_7 = arith.constant 0 : index
    %8 = vector.load %arg4[%c0_6, %c0_7] : memref<32x32xf32, #tpu.memory_space<vmem>>, vector<32x32xf32>
    %cst_8 = arith.constant dense<0.000000e+00> : vector<8x32xf32>
    %9 = tpu.matmul %7, %8, %cst_8 {dimension_numbers = #tpu.dot_dimension_numbers<[1], [0], [0], [1], [0, 0, 1, 1], [], []>} : vector<8x32xf32>, vector<32x32xf32>, vector<8x32xf32> -> vector<8x32xf32>
    %c0_9 = arith.constant 0 : index
    %c0_10 = arith.constant 0 : index
    %10 = vector.load %arg5[%c0_9, %c0_10] : memref<1x32xf32, #tpu.memory_space<vmem>>, vector<1x32xf32>
    %11 = vector.broadcast %10 : vector<1x32xf32> to vector<8x32xf32>
    %12 = arith.addf %9, %11 : vector<8x32xf32>
    %cst_11 = arith.constant 0.000000e+00 : f32
    %13 = vector.broadcast %cst_11 : f32 to vector<8x32xf32>
    %14 = arith.maximumf %12, %13 : vector<8x32xf32>
    %c0_12 = arith.constant 0 : index
    %c0_13 = arith.constant 0 : index
    %15 = vector.load %arg6[%c0_12, %c0_13] : memref<32x4xf32, #tpu.memory_space<vmem>>, vector<32x4xf32>
    %cst_14 = arith.constant dense<0.000000e+00> : vector<8x4xf32>
    %16 = tpu.matmul %14, %15, %cst_14 {dimension_numbers = #tpu.dot_dimension_numbers<[1], [0], [0], [1], [0, 0, 1, 1], [], []>} : vector<8x32xf32>, vector<32x4xf32>, vector<8x4xf32> -> vector<8x4xf32>
    %c0_15 = arith.constant 0 : index
    %c0_16 = arith.constant 0 : index
    %17 = vector.load %arg7[%c0_15, %c0_16] : memref<1x4xf32, #tpu.memory_space<vmem>>, vector<1x4xf32>
    %18 = vector.broadcast %17 : vector<1x4xf32> to vector<8x4xf32>
    %19 = arith.addf %16, %18 : vector<8x4xf32>
    %c0_17 = arith.constant 0 : index
    %c0_18 = arith.constant 0 : index
    %20 = vector.load %arg8[%c0_17, %c0_18] : memref<8x4xf32, #tpu.memory_space<vmem>>, vector<8x4xf32>
    tpu.vector_store %arg8[%c0_17, %c0_18], %19 {strides = array<i32>} : memref<8x4xf32, #tpu.memory_space<vmem>>, vector<8x4xf32>,
    return
  }
  func.func @transform_0(%arg0: i32) -> (i32, i32) {
    %c0_i32 = arith.constant 0 : i32
    %c0_i32_0 = arith.constant 0 : i32
    return %arg0, %c0_i32 : i32, i32
  }
  func.func @transform_1(%arg0: i32) -> (i32, i32) {
    %c0_i32 = arith.constant 0 : i32
    %c0_i32_0 = arith.constant 0 : i32
    %c0_i32_1 = arith.constant 0 : i32
    return %c0_i32, %c0_i32_0 : i32, i32
  }
  func.func @transform_2(%arg0: i32) -> (i32, i32) {
    %c0_i32 = arith.constant 0 : i32
    %c0_i32_0 = arith.constant 0 : i32
    %c0_i32_1 = arith.constant 0 : i32
    return %c0_i32, %c0_i32_0 : i32, i32
  }
  func.func @transform_3(%arg0: i32) -> (i32, i32) {
    %c0_i32 = arith.constant 0 : i32
    %c0_i32_0 = arith.constant 0 : i32
    %c0_i32_1 = arith.constant 0 : i32
    return %c0_i32, %c0_i32_0 : i32, i32
  }
  func.func @transform_4(%arg0: i32) -> (i32, i32) {
    %c0_i32 = arith.constant 0 : i32
    %c0_i32_0 = arith.constant 0 : i32
    %c0_i32_1 = arith.constant 0 : i32
    return %c0_i32, %c0_i32_0 : i32, i32
  }
  func.func @transform_5(%arg0: i32) -> (i32, i32) {
    %c0_i32 = arith.constant 0 : i32
    %c0_i32_0 = arith.constant 0 : i32
    %c0_i32_1 = arith.constant 0 : i32
    return %c0_i32, %c0_i32_0 : i32, i32
  }
  func.func @transform_6(%arg0: i32) -> (i32, i32) {
    %c0_i32 = arith.constant 0 : i32
    %c0_i32_0 = arith.constant 0 : i32
    %c0_i32_1 = arith.constant 0 : i32
    return %c0_i32, %c0_i32_0 : i32, i32
  }
  func.func @transform_7(%arg0: i32) -> (i32, i32) {
    %c0_i32 = arith.constant 0 : i32
    %c0_i32_0 = arith.constant 0 : i32
    return %arg0, %c0_i32 : i32, i32
  }
}

</mosaic_0001>

<bundles_post_ra>
// kernel: tpu_custom_call.1
= control target key start
LH: loop header
LB: loop body
LE: loop exit
PB: predicated region body
PF: predicated region fallthrough
CT: control target
= control target key end

     0   :  { %12 = vsyncpa [#allocation3], 0  ;;  %s308_s0 = inlined_call_operand.hbm [shape: f32[8,16], index: 0, kind: input, shape index: {}]   ;;  %s309_s1 = inlined_call_operand.hbm [shape: f32[16,32], index: 1, kind: input, shape index: {}]   ;;  %s310_s2 = inlined_call_operand.vmem [shape: f32[1,32], index: 2, kind: input, shape index: {}]   ;;  %s311_s3 = inlined_call_operand.vmem [shape: f32[32,32], index: 3, kind: input, shape index: {}]   ;;  %s312_s4 = inlined_call_operand.vmem [shape: f32[1,32], index: 4, kind: input, shape index: {}]   ;;  %s313_s5 = inlined_call_operand.vmem [shape: f32[32,4], index: 5, kind: input, shape index: {}]   ;;  %s314_s6 = inlined_call_operand.vmem [shape: f32[1,4], index: 6, kind: input, shape index: {}]   ;;  %s315_s7 = inlined_call_operand.vmem [shape: f32[8,4], index: 7, kind: output, shape index: {}]  }
   0x1   :  { %s19_s26 = sshll.u32 %s308_s0, 4  ;;  %s20_s26 = int_to_ptr.hbm [resolvable:$true] %s19_s26 }
   0x2   :  { %13 = vsyncpa [#allocation5], 0  ;;  %s222_s27 = smov [#allocation2]   ;;  %s29_s8 = sshll.u32 %s309_s1, 4  ;;  %s30_s8 = int_to_ptr.hbm [resolvable:$true] %s29_s8 }
   0x3   :  { %s21_s28 = sshll.u32 %s222_s27, 4  ;;  %s223_s9 = smov [#allocation4]   ;;  %s22_s28 = int_to_ptr.vmem [resolvable:$true] %s21_s28 }
   0x4   :  { %24 = dma.hbm_to_vmem [thread:$0]  %s20_s26, 128, %s22_s28, [#allocation3]  }
   0x5   :  { %s31_s10 = sshll.u32 %s223_s9, 4  ;;  %s224_s11 = smov 128   ;;  %s32_s10 = int_to_ptr.vmem [resolvable:$true] %s31_s10 }
   0x6   :  { %s225_s12 = smov 8  }
   0x7   :  { %37 = dma.hbm_to_vmem [thread:$0]  %s30_s8, 256, %s32_s10, [#allocation5], %s224_s11, %s224_s11, %s225_s12  }
   0x8   :  { %218 = dma.done.wait [#allocation3], 128  }
   0x9   :  { %219 = vsyncadd [#allocation3], 4294967168 }
   0xa   :  { %220 = dma.done.wait [#allocation5], 256  }
   0xb   :  { %221 = vsyncadd [#allocation5], 4294967040  ;;  %v58_v0 = vld [vmem:[#allocation4 + $0x8] sm:$0xff]  ;;  %v57_v1 = vld [vmem:[#allocation4] sm:$0xff]  ;;  %vm63_vm0 = vcmask 130048   ;;  %vm96_vm1 = vcmask 261120  }
   0xc   :  { %81 = vmatpush.msra.mxu0 %v58_v0  ;;  %v56_v2 = vld [vmem:[#allocation2] sm:$0xff]  ;;  %v91_v3 = vld [vmem:[%s311_s3 + $0x18] sm:$0xff]  ;;  %v90_v4 = vld [vmem:[%s311_s3 + $0x10] sm:$0xff]  ;;  %vm152_vm2 = vcmask 31744  }
   0xd   :  { %112 = vmatpush.msra.mxu1 %v91_v3  ;;  %v89_v5 = vld [vmem:[%s311_s3 + $0x8] sm:$0xff]  ;;  %v88_v6 = vld [vmem:[%s311_s3] sm:$0xff]  ;;  %v124_v7 = vld [vmem:[%s313_s5 + $0x18] sm:$0xff] }
   0xe   :  { %82 = vmatpush.msra.mxu0 %v57_v1  ;;  %144 = vmatpush.msra.mxu2 %v124_v7  ;;  %v167_v8 = vld [vmem:[%s310_s2] ss:$0 sm:$0xff]  ;;  %v123_v12 = vld [vmem:[%s313_s5 + $0x10] sm:$0xff]  ;;  %v122_v13 = vld [vmem:[%s313_s5 + $0x8] sm:$0xff] }
   0xf   :  { %160 = vmatmul.msk.f32.vlgmr.msra.gmra.mxu0 %vm63_vm0, %v56_v2  ;;  %113 = vmatpush.msra.mxu1 %v90_v4  ;;  %v121_v14 = vld [vmem:[%s313_s5] sm:$0xff] }
  0x10   :  { %145 = vmatpush.msra.mxu2 %v123_v12  ;;  %v168_v15 = vld [vmem:[%s312_s4] ss:$0 sm:$0xff] }
  0x11   :  { %114 = vmatpush.msra.mxu1 %v89_v5  ;;  %v169_v19 = vld [vmem:[%s314_s6] ss:$0 sm:$0xff] }
  0x12   :  { %146 = vmatpush.msra.mxu2 %v122_v13 }
  0x13   :  { %115 = vmatpush.msra.mxu1 %v88_v6 }
  0x14   :  { %147 = vmatpush.msra.mxu2 %v121_v14 }
  0x8c   :  { %v84_v9 = vpop.f32.mrf.mxu0 }
  0x8d   :  { %v85_v10 = vadd.f32 %v167_v8, %v84_v9 }
  0x8f   :  { %v87_v11 = vmax.f32 %v85_v10, 0.0 }
  0x91   :  { %161 = vmatmul.msk.f32.vlgmr.msra.gmra.mxu1 %vm96_vm1, %v87_v11 }
 0x10e   :  { %v117_v16 = vpop.f32.mrf.mxu1 }
 0x10f   :  { %v118_v17 = vadd.f32 %v168_v15, %v117_v16 }
 0x111   :  { %v120_v18 = vmax.f32 %v118_v17, 0.0 }
 0x113   :  { %162 = vmatmul.msk.f32.vlgmr.msra.gmra.mxu2 %vm96_vm1, %v120_v18 }
 0x196   :  { %v149_v20 = vpop.f32.mrf.mxu2 }
 0x197   :  { %v150_v21 = vadd.f32 %v169_v19, %v149_v20 }
 0x199   :  { %153 = vst.msk [vmem:[%s315_s7] sm:$0xff] %vm152_vm2, %v150_v21 }
 0x19a   :  { %158 = vsyncpa [#allocation3], 1 }
 0x19b   :  { %159 = vsyncpa [#allocation5], 1 }

</bundles_post_ra>
